<compile_context>
chip_gen: v5e
topology: v5e:2x2
jax: 0.10.0
libtpu: 0.0.40
codegen_flags: <defaults>
</compile_context>

<pallas_src>
import jax
import jax.numpy as jnp
from jax.experimental import pallas as pl
from jax.experimental.pallas import tpu as pltpu


# ----------------------------- kernels -------------------------------------


def _maintask_kernel(x_ref, w_ref, b_ref, o_ref, acc_ref):
    # x_ref: (TB, TS, N) native dtype    w_ref: (N, OUT) f32, pre-scaled by 1/S
    # b_ref: (1, OUT) f32                o_ref: (TB, OUT)
    # acc_ref: (TB, N) f32 VMEM scratch (running sum over S)
    s = pl.program_id(1)

    @pl.when(s == 0)
    def _():
        acc_ref[...] = jnp.zeros_like(acc_ref)

    # Per-tile partial sum over S accumulated in f32; the x tile itself is
    # never materialized as an f32 copy (only the accumulator is f32).
    acc_ref[...] += jnp.sum(x_ref[...], axis=1, dtype=jnp.float32)

    @pl.when(s == pl.num_programs(1) - 1)
    def _():
        # acc already holds sum(x, axis=1); w is pre-scaled by 1/S, so this is
        # exactly mean(x, axis=1) @ W.T + b.
        y = jnp.dot(acc_ref[...], w_ref[...],
                    preferred_element_type=jnp.float32)
        o_ref[...] = (y + b_ref[...]).astype(o_ref.dtype)


def _pretrain_kernel(x_ref, w_ref, b_ref, o_ref):
    # x_ref: (TB, N) native dtype, w_ref: (N, OUT) in x dtype, b_ref: (1, OUT) f32
    y = jnp.dot(x_ref[...], w_ref[...], preferred_element_type=jnp.float32)
    o_ref[...] = (y + b_ref[...]).astype(o_ref.dtype)


# ----------------------------- tiling --------------------------------------

# Per-buffer x-tile budget; double-buffered this is ~8 MiB of VMEM.
_X_TILE_BYTES = 4 * 1024 * 1024


def _pick_tile(dim, max_tile, align):
    """Largest tile <= max_tile that divides `dim` and satisfies the TPU block
    constraint: either a multiple of `align` or the full dimension."""
    if dim <= max_tile:
        return dim
    for t in range(min(max_tile, dim), 0, -1):
        if dim % t == 0 and t % align == 0:
            return t
    return dim  # fallback: full dim (only if no aligned divisor exists)


# ----------------------------- wrappers ------------------------------------


def _maintask_forward(x, w, b):
    B, S, N = x.shape
    OUT = w.shape[0]

    # Fold the 1/S mean scale into the pre-transposed weight (host side).
    w_t = (jnp.transpose(w) / jnp.float32(S)).astype(jnp.float32)  # (N, OUT)
    b2 = b.reshape(1, OUT).astype(jnp.float32)                     # (1, OUT)

    tb = _pick_tile(B, 512, 8)
    max_ts = max(8, _X_TILE_BYTES // max(1, tb * N * x.dtype.itemsize))
    ts = _pick_tile(S, max_ts, 8)
    grid = (B // tb, S // ts)

    cost = pl.CostEstimate(
        flops=B * S * N + 2 * B * N * OUT,
        transcendentals=0,
        bytes_accessed=(x.size * x.dtype.itemsize + w_t.size * 4
                        + b2.size * 4 + B * OUT * x.dtype.itemsize),
    )

    return pl.pallas_call(
        _maintask_kernel,
        out_shape=jax.ShapeDtypeStruct((B, OUT), x.dtype),
        grid_spec=pltpu.PrefetchScalarGridSpec(
            num_scalar_prefetch=0,
            grid=grid,
            in_specs=[
                pl.BlockSpec((tb, ts, N), lambda i, s: (i, s, 0)),
                pl.BlockSpec((N, OUT), lambda i, s: (0, 0)),
                pl.BlockSpec((1, OUT), lambda i, s: (0, 0)),
            ],
            out_specs=pl.BlockSpec((tb, OUT), lambda i, s: (i, 0)),
            scratch_shapes=[pltpu.VMEM((tb, N), jnp.float32)],
        ),
        compiler_params=pltpu.CompilerParams(
            dimension_semantics=("parallel", "arbitrary")),
        cost_estimate=cost,
    )(x, w_t, b2)


def _pretrain_forward(x, w, b):
    B, N = x.shape
    OUT = w.shape[0]

    w_t = jnp.transpose(w).astype(x.dtype)       # (N, OUT): MXU eats native dtype
    b2 = b.reshape(1, OUT).astype(jnp.float32)   # (1, OUT)

    tb = _pick_tile(B, 1024, 8)
    grid = (B // tb,)

    cost = pl.CostEstimate(
        flops=2 * B * N * OUT,
        transcendentals=0,
        bytes_accessed=(x.size * x.dtype.itemsize
                        + w_t.size * w_t.dtype.itemsize
                        + b2.size * 4 + B * OUT * x.dtype.itemsize),
    )

    return pl.pallas_call(
        _pretrain_kernel,
        out_shape=jax.ShapeDtypeStruct((B, OUT), x.dtype),
        grid_spec=pltpu.PrefetchScalarGridSpec(
            num_scalar_prefetch=0,
            grid=grid,
            in_specs=[
                pl.BlockSpec((tb, N), lambda i: (i, 0)),
                pl.BlockSpec((N, OUT), lambda i: (0, 0)),
                pl.BlockSpec((1, OUT), lambda i: (0, 0)),
            ],
            out_specs=pl.BlockSpec((tb, OUT), lambda i: (i, 0)),
        ),
        compiler_params=pltpu.CompilerParams(
            dimension_semantics=("parallel",)),
        cost_estimate=cost,
    )(x, w_t, b2)


def classifier_forward(x, w, b, task="maintask"):
    """Pallas implementation of ClassifierModule.forward.

    x: (B, S, N) for 'maintask', (B, N) for 'pretrain'
    w: (out_features, N)  -- PyTorch nn.Linear weight layout
    b: (out_features,)
    """
    if task == "maintask":
        return _maintask_forward(x, w, b)
    if task == "pretrain":
        return _pretrain_forward(x, w, b)
    # task == 'graph' defines no fc layer; the PyTorch forward would raise.
    raise ValueError(f"task '{task}' has no fc layer / no forward path")


# ----------------------------- demo ----------------------------------------

if __name__ == "__main__":
    nodes = 16
    batch, seq = 2, 8

    key = jax.random.PRNGKey(0)
    k_x, k_w1, k_b1, k_x2, k_w2, k_b2 = jax.random.split(key, 6)

    # -------- maintask: mean over dim=1 then Linear(nodes, 2) --------
    x_main = jax.random.normal(k_x, (batch, seq, nodes), dtype=jnp.float32)
    w_main = jax.random.normal(k_w1, (2, nodes), dtype=jnp.float32) * 0.1
    b_main = jax.random.normal(k_b1, (2,), dtype=jnp.float32) * 0.1

    y_main = jax.block_until_ready(
        classifier_forward(x_main, w_main, b_main, task="maintask"))
    ref_main = jnp.mean(x_main, axis=1) @ w_main.T + b_main
    assert y_main.shape == (batch, 2)
    assert jnp.allclose(y_main, ref_main, atol=1e-5, rtol=1e-5)

    # -------- pretrain: Linear(nodes, 4), no reduction --------
    x_pre = jax.random.normal(k_x2, (batch, nodes), dtype=jnp.float32)
    w_pre = jax.random.normal(k_w2, (4, nodes), dtype=jnp.float32) * 0.1
    b_pre = jax.random.normal(k_b2, (4,), dtype=jnp.float32) * 0.1

    y_pre = jax.block_until_ready(
        classifier_forward(x_pre, w_pre, b_pre, task="pretrain"))
    ref_pre = x_pre @ w_pre.T + b_pre
    assert y_pre.shape == (batch, 4)
    assert jnp.allclose(y_pre, ref_pre, atol=1e-5, rtol=1e-5)

    print("KERNEL_OK")
</pallas_src>

<mosaic_0001>
module attributes {stable_mosaic.version = 11 : i64} {
  func.func @_maintask_kernel(%arg0: i32, %arg1: i32, %arg2: memref<2x8x16xf32, #tpu.memory_space<vmem>>, %arg3: memref<16x2xf32, #tpu.memory_space<vmem>>, %arg4: memref<1x2xf32, #tpu.memory_space<vmem>>, %arg5: memref<2x2xf32, #tpu.memory_space<vmem>>, %arg6: memref<2x16xf32, #tpu.memory_space<vmem>>) attributes {dimension_semantics = [#tpu.dimension_semantics<parallel>, #tpu.dimension_semantics<arbitrary>], iteration_bounds = array<i64: 1, 1>, scalar_prefetch = 0 : i64, scratch_operands = 1 : i64, tpu.core_type = #tpu.core_type<tc>, window_params = [{transform_indices = @transform_0, window_bounds = array<i64: 2, 8, 16>}, {pipeline_mode = #tpu.pipeline_mode<synchronous>, transform_indices = @transform_1, window_bounds = array<i64: 16, 2>}, {pipeline_mode = #tpu.pipeline_mode<synchronous>, transform_indices = @transform_2, window_bounds = array<i64: 1, 2>}, {transform_indices = @transform_3, window_bounds = array<i64: 2, 2>}]} {
    %c0_i32 = arith.constant 0 : i32
    %0 = arith.cmpi eq, %arg1, %c0_i32 : i32
    %1 = arith.extui %0 : i1 to i32
    %c0_i32_0 = arith.constant 0 : i32
    %2 = arith.cmpi ne, %1, %c0_i32_0 : i32
    scf.if %2 {
      %cst_9 = arith.constant 0.000000e+00 : f32
      %11 = vector.broadcast %cst_9 : f32 to vector<2x16xf32>
      %c0_10 = arith.constant 0 : index
      %c0_11 = arith.constant 0 : index
      %12 = vector.load %arg6[%c0_10, %c0_11] : memref<2x16xf32, #tpu.memory_space<vmem>>, vector<2x16xf32>
      tpu.vector_store %arg6[%c0_10, %c0_11], %11 {strides = array<i32>} : memref<2x16xf32, #tpu.memory_space<vmem>>, vector<2x16xf32>,
    } else {
    }
    %c0 = arith.constant 0 : index
    %c0_1 = arith.constant 0 : index
    %3 = vector.load %arg6[%c0, %c0_1] : memref<2x16xf32, #tpu.memory_space<vmem>>, vector<2x16xf32>
    %c0_2 = arith.constant 0 : index
    %c0_3 = arith.constant 0 : index
    %c0_4 = arith.constant 0 : index
    %4 = vector.load %arg2[%c0_2, %c0_3, %c0_4] : memref<2x8x16xf32, #tpu.memory_space<vmem>>, vector<2x8x16xf32>
    %cst = arith.constant dense<0.000000e+00> : vector<2x16xf32>
    %5 = vector.multi_reduction <add>, %4, %cst [1] : vector<2x8x16xf32> to vector<2x16xf32>
    %6 = arith.addf %3, %5 : vector<2x16xf32>
    %c0_5 = arith.constant 0 : index
    %c0_6 = arith.constant 0 : index
    %7 = vector.load %arg6[%c0_5, %c0_6] : memref<2x16xf32, #tpu.memory_space<vmem>>, vector<2x16xf32>
    tpu.vector_store %arg6[%c0_5, %c0_6], %6 {strides = array<i32>} : memref<2x16xf32, #tpu.memory_space<vmem>>, vector<2x16xf32>,
    %c0_i32_7 = arith.constant 0 : i32
    %8 = arith.cmpi eq, %arg1, %c0_i32_7 : i32
    %9 = arith.extui %8 : i1 to i32
    %c0_i32_8 = arith.constant 0 : i32
    %10 = arith.cmpi ne, %9, %c0_i32_8 : i32
    scf.if %10 {
      %c0_9 = arith.constant 0 : index
      %c0_10 = arith.constant 0 : index
      %11 = vector.load %arg6[%c0_9, %c0_10] : memref<2x16xf32, #tpu.memory_space<vmem>>, vector<2x16xf32>
      %c0_11 = arith.constant 0 : index
      %c0_12 = arith.constant 0 : index
      %12 = vector.load %arg3[%c0_11, %c0_12] : memref<16x2xf32, #tpu.memory_space<vmem>>, vector<16x2xf32>
      %cst_13 = arith.constant dense<0.000000e+00> : vector<2x2xf32>
      %13 = tpu.matmul %11, %12, %cst_13 {dimension_numbers = #tpu.dot_dimension_numbers<[1], [0], [0], [1], [0, 0, 1, 1], [], []>} : vector<2x16xf32>, vector<16x2xf32>, vector<2x2xf32> -> vector<2x2xf32>
      %c0_14 = arith.constant 0 : index
      %c0_15 = arith.constant 0 : index
      %14 = vector.load %arg4[%c0_14, %c0_15] : memref<1x2xf32, #tpu.memory_space<vmem>>, vector<1x2xf32>
      %15 = vector.broadcast %14 : vector<1x2xf32> to vector<2x2xf32>
      %16 = arith.addf %13, %15 : vector<2x2xf32>
      %c0_16 = arith.constant 0 : index
      %c0_17 = arith.constant 0 : index
      %17 = vector.load %arg5[%c0_16, %c0_17] : memref<2x2xf32, #tpu.memory_space<vmem>>, vector<2x2xf32>
      tpu.vector_store %arg5[%c0_16, %c0_17], %16 {strides = array<i32>} : memref<2x2xf32, #tpu.memory_space<vmem>>, vector<2x2xf32>,
    } else {
    }
    return
  }
  func.func @transform_0(%arg0: i32, %arg1: i32) -> (i32, i32, i32) {
    %c0_i32 = arith.constant 0 : i32
    %c0_i32_0 = arith.constant 0 : i32
    return %arg0, %arg1, %c0_i32 : i32, i32, i32
  }
  func.func @transform_1(%arg0: i32, %arg1: i32) -> (i32, i32) {
    %c0_i32 = arith.constant 0 : i32
    %c0_i32_0 = arith.constant 0 : i32
    %c0_i32_1 = arith.constant 0 : i32
    return %c0_i32, %c0_i32_0 : i32, i32
  }
  func.func @transform_2(%arg0: i32, %arg1: i32) -> (i32, i32) {
    %c0_i32 = arith.constant 0 : i32
    %c0_i32_0 = arith.constant 0 : i32
    %c0_i32_1 = arith.constant 0 : i32
    return %c0_i32, %c0_i32_0 : i32, i32
  }
  func.func @transform_3(%arg0: i32, %arg1: i32) -> (i32, i32) {
    %c0_i32 = arith.constant 0 : i32
    %c0_i32_0 = arith.constant 0 : i32
    return %arg0, %c0_i32 : i32, i32
  }
}

</mosaic_0001>

<bundles_post_ra>
// kernel: tpu_custom_call.1
= control target key start
LH: loop header
LB: loop body
LE: loop exit
PB: predicated region body
PF: predicated region fallthrough
CT: control target
= control target key end

     0   :  { %vm19_vm0 = vcmask 123904   ;;  %vm24_vm1 = vcmask 130048   ;;  %v128_v3 = vmov 0.0   ;;  %s173_s0 = inlined_call_operand.vmem [shape: f32[2,8,16], index: 0, kind: input, shape index: {}]   ;;  %s174_s1 = inlined_call_operand.vmem [shape: f32[16,2], index: 1, kind: input, shape index: {}]   ;;  %s175_s2 = inlined_call_operand.vmem [shape: f32[1,2], index: 2, kind: input, shape index: {}]   ;;  %s176_s3 = inlined_call_operand.hbm [shape: f32[2,2], index: 3, kind: output, shape index: {}]  }
   0x1   :  { %v52_v0 = vld [vmem:[%s174_s1 + $0x8] sm:$0xff]  ;;  %v51_v1 = vld [vmem:[%s174_s1] sm:$0xff]  ;;  %20 = vst.msk [vmem:[#allocation2] sm:$0x3] %vm19_vm0, %v128_v3 }
   0x2   :  { %v22_v2 = vld [vmem:[%s173_s0] sm:$0xff]  ;;  %74 = vmatpush.msra.mxu0 %v52_v0  ;;  %v23_v4 = vld [vmem:[%s173_s0 + $0x8] sm:$0xff] }
   0x3   :  { %v25_v5 = vsel %vm24_vm1, %v22_v2, 0.0  ;;  %v32_v7 = vsel %vm24_vm1, %v23_v4, 0.0 }
   0x4   :  { %v26_v6 = vrot.slane %v25_v5, 4  ;;  %75 = vmatpush.msra.mxu0 %v51_v1  ;;  %v33_v8 = vrot.slane %v32_v7, 4 }
   0x5   :  { %8 = vsyncpa [#allocation4], 0  ;;  %vm41_vm2 = vcmask 1041409   ;;  %v101_v23 = vld [vmem:[%s175_s2] ss:$0 sm:$0xff]  ;;  %s129_s20 = smov [#allocation3]  }
   0x6   :  { %v27_v9 = vadd.f32 %v26_v6, %v25_v5  ;;  %v34_v10 = vadd.f32 %v33_v8, %v32_v7  ;;  %s87_s21 = sshll.u32 %s129_s20, 4  ;;  %s89_s24 = sshll.u32 %s176_s3, 4  ;;  %vm80_vm3 = vcmask 9216   ;;  %s88_s21 = int_to_ptr.vmem [resolvable:$true] %s87_s21  ;;  %s90_s24 = int_to_ptr.hbm [resolvable:$true] %s89_s24 }
   0x8   :  { %v28_v11 = vrot.slane %v27_v9, 2  ;;  %v35_v12 = vrot.slane %v34_v10, 2  ;;  %v21_v18 = vld [vmem:[#allocation2] sm:$0x3] }
   0xa   :  { %v29_v13 = vadd.f32 %v28_v11, %v27_v9  ;;  %v36_v14 = vadd.f32 %v35_v12, %v34_v10 }
   0xc   :  { %v30_v15 = vrot.slane %v29_v13, 1  ;;  %v37_v16 = vrot.slane %v36_v14, 1 }
   0xe   :  { %v31_v17 = vadd.f32 %v30_v15, %v29_v13  ;;  %v38_v19 = vadd.f32 %v37_v16, %v36_v14 }
  0x10   :  { %v42_v20 = vsel %vm41_vm2, %v38_v19, %v31_v17 }
  0x11   :  { %v44_v21 = vadd.f32 %v42_v20, %v21_v18 }
  0x13   :  { %46 = vst.msk [vmem:[#allocation2] sm:$0x3] %vm19_vm0, %v44_v21 }
  0x1a   :  { %v50_v22 = vld [vmem:[#allocation2] sm:$0x3] }
  0x1b   :  { %98 = vmatmul.msk.f32.vlgmr.msra.gmra.mxu0 %vm24_vm1, %v50_v22 }
  0x98   :  { %v77_v24 = vpop.f32.mrf.mxu0 }
  0x99   :  { %v78_v25 = vadd.f32 %v101_v23, %v77_v24 }
  0x9b   :  { %81 = vst.msk [vmem:[#allocation3] sm:$0x3] %vm80_vm3, %v78_v25 }
  0x9c   :  { %92 = dma.vmem_to_hbm [thread:$0]  %s88_s21, 32, %s90_s24, [#allocation4]  }
  0x9d   :  { %126 = dma.done.wait [#allocation4], 32  }
  0x9e   :  { %127 = vsyncadd [#allocation4], 4294967264 }
  0x9f   :  { %97 = vsyncpa [#allocation4], 1 }

</bundles_post_ra>
